<compile_context>
chip_gen: v7x
topology: tpu7x:2x2x1
jax: 0.10.0
libtpu: 0.0.40
codegen_flags: <defaults>
</compile_context>

<pallas_src>
import jax
import jax.numpy as jnp
from jax.experimental import pallas as pl
from jax.experimental.pallas import tpu as pltpu


# ---------------------------------------------------------------------------
# Kernel bodies
# ---------------------------------------------------------------------------
def _copy_kernel(x_ref, o_ref):
    # Pure bandwidth path: channel dim is squeezed away by the BlockSpec, so
    # the transpose is done entirely by DMA addressing.
    #   x_ref: (tb, tH, W)   o_ref: (tb, tH, W)
    o_ref[...] = x_ref[...]


def _interleave_kernel(x_ref, o_ref):
    # Lane-densifying path: kc channels per grid step so the output block's
    # last dim (kc*W) is a multiple of 128 (or the full C*W dim).
    #   x_ref: (tb, kc, tH, W) -> o_ref: (tb, tH, kc*W)
    x = x_ref[...]
    tb, kc, tH, W = x.shape
    o_ref[...] = jnp.transpose(x, (0, 2, 1, 3)).reshape(tb, tH, kc * W)


# ---------------------------------------------------------------------------
# Tiling selection
# ---------------------------------------------------------------------------
def _choose_tiling(B, C, H, W, itemsize, budget_bytes):
    """Pick (kc, tH, tb): channels / H-rows / batches per grid step."""
    # --- kc: output last dim kc*W must be a multiple of 128 lanes, or equal
    #         the full C*W (always legal).  W lane-dense -> pure-copy path.
    if W % 128 == 0:
        kc = 1
    else:
        kc = C  # fallback: full-channel block (full-dim is always legal)
        for d in range(1, C):
            if C % d == 0 and (d * W) % 128 == 0:
                kc = d
                break

    def blk_bytes(th, nb=1):
        return nb * kc * th * W * itemsize

    # --- tH: multiple of 8 sublanes (or full H); largest divisor under budget.
    if blk_bytes(H) <= budget_bytes:
        tH = H
    else:
        fitting = [d for d in range(8, H, 8)
                   if H % d == 0 and blk_bytes(d) <= budget_bytes]
        if fitting:
            tH = max(fitting)
        else:
            smallest = [d for d in range(8, H, 8) if H % d == 0]
            tH = min(smallest) if smallest else H  # correctness over budget

    # --- tb: fuse batches when whole-H blocks are tiny (amortize step overhead).
    tb = 1
    if tH == H:
        for d in range(B, 0, -1):
            if B % d == 0 and blk_bytes(H, d) <= budget_bytes:
                tb = d
                break
    return kc, tH, tb


# ---------------------------------------------------------------------------
# Wrapper
# ---------------------------------------------------------------------------
def my_flatten_layer(x, *, vmem_block_budget_bytes=2 * 1024 * 1024):
    """Pallas implementation of MyFlattenLayer.forward for a 4-D input.

    x: (B, C, H, W)  ->  (B, H, C*W)
    """
    B, C, H, W = x.shape
    itemsize = jnp.dtype(x.dtype).itemsize
    kc, tH, tb = _choose_tiling(B, C, H, W, itemsize, vmem_block_budget_bytes)

    grid = (B // tb, H // tH, C // kc)
    out_shape = jax.ShapeDtypeStruct((B, H, C * W), x.dtype)

    if kc == 1:
        kernel = _copy_kernel
        # Channel dim squeezed out of the kernel ref -> body is a pure copy.
        in_spec = pl.BlockSpec((tb, None, tH, W), lambda b, h, c: (b, c, h, 0))
    else:
        kernel = _interleave_kernel
        in_spec = pl.BlockSpec((tb, kc, tH, W), lambda b, h, c: (b, c, h, 0))
    out_spec = pl.BlockSpec((tb, tH, kc * W), lambda b, h, c: (b, h, c))

    cost = pl.CostEstimate(
        flops=0,
        transcendentals=0,
        bytes_accessed=2 * B * C * H * W * itemsize,  # read + write, pure BW op
    )

    return pl.pallas_call(
        kernel,
        out_shape=out_shape,
        grid_spec=pltpu.PrefetchScalarGridSpec(
            num_scalar_prefetch=0,
            grid=grid,
            in_specs=[in_spec],
            out_specs=out_spec,
        ),
        compiler_params=pltpu.CompilerParams(
            # All writes are independent -> every axis parallel (v7x 2-TC sharding;
            # no-op on single-TC v5e/v6e).  Blocks are budgeted to fit the default
            # scoped VMEM on all generations, so no vmem_limit override is needed.
            dimension_semantics=("parallel", "parallel", "parallel"),
        ),
        cost_estimate=cost,
    )(x)


def _reference(x):
    # Pure-JAX reference mirroring the PyTorch semantics exactly.
    xt = jnp.swapaxes(x, 1, 2)
    return xt.reshape(xt.shape[0], xt.shape[1], -1)


if __name__ == "__main__":
    key = jax.random.PRNGKey(0)
    B, C, H, W = 2, 4, 16, 16
    x = jax.random.normal(key, (B, C, H, W), dtype=jnp.float32)

    out = my_flatten_layer(x)
    out = jax.block_until_ready(out)

    ref = _reference(x)
    assert out.shape == (B, H, C * W), out.shape
    assert jnp.array_equal(out, ref), "mismatch vs reference"

    # TODO(synk): PyTorch layer is rank-agnostic; only the rank-4 conv-feature
    # case is implemented here.
    print("KERNEL_OK")
</pallas_src>

<mosaic_0001>
module attributes {stable_mosaic.version = 11 : i64} {
  func.func @_interleave_kernel(%arg0: i32, %arg1: i32, %arg2: i32, %arg3: memref<2x4x16x16xf32, #tpu.memory_space<vmem>>, %arg4: memref<2x16x64xf32, #tpu.memory_space<vmem>>) attributes {dimension_semantics = [#tpu.dimension_semantics<parallel>, #tpu.dimension_semantics<parallel>, #tpu.dimension_semantics<parallel>], iteration_bounds = array<i64: 1, 1, 1>, scalar_prefetch = 0 : i64, scratch_operands = 0 : i64, tpu.core_type = #tpu.core_type<tc>, window_params = [{transform_indices = @transform_0, window_bounds = array<i64: 2, 4, 16, 16>}, {transform_indices = @transform_1, window_bounds = array<i64: 2, 16, 64>}]} {
    %c0 = arith.constant 0 : index
    %c0_0 = arith.constant 0 : index
    %c0_1 = arith.constant 0 : index
    %c0_2 = arith.constant 0 : index
    %0 = vector.load %arg3[%c0, %c0_0, %c0_1, %c0_2] : memref<2x4x16x16xf32, #tpu.memory_space<vmem>>, vector<2x4x16x16xf32>
    %1 = tpu.transpose %0, [0, 2, 1, 3] : vector<2x4x16x16xf32> -> vector<2x16x4x16xf32>
    %2 = vector.shape_cast %1 : vector<2x16x4x16xf32> to vector<2x16x64xf32>
    %c0_3 = arith.constant 0 : index
    %c0_4 = arith.constant 0 : index
    %c0_5 = arith.constant 0 : index
    %3 = vector.load %arg4[%c0_3, %c0_4, %c0_5] : memref<2x16x64xf32, #tpu.memory_space<vmem>>, vector<2x16x64xf32>
    tpu.vector_store %arg4[%c0_3, %c0_4, %c0_5], %2 {strides = array<i32>} : memref<2x16x64xf32, #tpu.memory_space<vmem>>, vector<2x16x64xf32>,
    return
  }
  func.func @transform_0(%arg0: i32, %arg1: i32, %arg2: i32) -> (i32, i32, i32, i32) {
    %c0_i32 = arith.constant 0 : i32
    %c0_i32_0 = arith.constant 0 : i32
    return %arg0, %arg2, %arg1, %c0_i32 : i32, i32, i32, i32
  }
  func.func @transform_1(%arg0: i32, %arg1: i32, %arg2: i32) -> (i32, i32, i32) {
    %c0_i32 = arith.constant 0 : i32
    return %arg0, %arg1, %arg2 : i32, i32, i32
  }
}

</mosaic_0001>

<bundles_post_ra>
// kernel: tpu_custom_call.1
= control target key start
LH: loop header
LB: loop body
LE: loop exit
PB: predicated region body
PF: predicated region fallthrough
CT: control target
= control target key end

     0   :  { %6 = vsyncpa [#allocation3], 0  ;;  %s936_s0 = inlined_call_operand.hbm [shape: f32[2,4,16,16], index: 0, kind: input, shape index: {}]   ;;  %s937_s1 = inlined_call_operand.hbm [shape: f32[2,16,64], index: 1, kind: output, shape index: {}]  }
   0x1   :  { %7 = vsyncpa [#allocation4], 0  ;;  %s733_s6 = smov [#allocation2]   ;;  %s685_s10 = scalar_lea.hbm %s936_s0, 2048 }
   0x2   :  { %s13_s7 = sshll.u32 %s733_s6, 4  ;;  %p686_p0 = scmp.ne.s32.totalorder %s936_s0, %s685_s10  ;;  %s14_s7 = int_to_ptr.vmem [resolvable:$true] %s13_s7 }
   0x3   :  { %p689_p1 = scmp.lt.u32.totalorder %s685_s10, %s936_s0 }
   0x5   :  { %p691_p2 = pnand %p689_p1, %p686_p0 }
   0x7   :  { %694 = shalt.err (!%p691_p2)
}
   0x8   :  { %s695_s15 = scalar_lea.vmem %s14_s7, 2048  ;;  %p700_p4 = scmp.lt.s32.totalorder %s14_s7, %s14_s7 }
   0x9   :  { %p696_p3 = scmp.ne.s32.totalorder %s14_s7, %s695_s15  ;;  %p701_p5 = scmp.lt.s32.totalorder %s695_s15, %s695_s15 }
   0xb   :  { %p702_p6 = por %p701_p5, %p700_p4 }
   0xd   :  { %p703_p7 = pnand %p702_p6, %p696_p3 }
   0xf   :  { %706 = shalt.err (!%p703_p7)
}
  0x10   :  { %s734_s16 = smov 128   ;;  %s735_s17 = smov 8  }
  0x11   :  { %19 = dma.hbm_to_vmem [thread:$0]  %s936_s0, 2048, %s14_s7, [#allocation3], %s734_s16, %s734_s16, %s735_s17  }
  0x12   :  { %729 = dma.done.wait [#allocation3], 2048  }
  0x13   :  { %730 = vsyncadd [#allocation3], 4294965248  ;;  %v44_v0 = vlaneseq  ;;  %v736_v1 = vmov 1983009808   ;;  %v737_v3 = vmov 1934713408  }
  0x14   :  { %v42_v2 = vunpack.c.l.s4 %v736_v1  ;;  %v74_v4 = vunpack.c.l.s4 %v737_v3  ;;  %v31_v9 = vld [vmem:[#allocation2 + $0x40] sm:$0xff]  ;;  %v33_v10 = vld [vmem:[#allocation2 + $0x50] sm:$0xff]  ;;  %v32_v22 = vld [vmem:[#allocation2 + $0x48] sm:$0xff]  ;;  %s738_s0 = smov 16   ;;  %s739_s20 = smov 32   ;;  %vm636_vm0 = vcmask 261120  }
  0x15   :  { %v45_v5 = vshrl.u32 %v44_v0, 7  ;;  %v35_v11 = vld [vmem:[#allocation2 + $0x60] sm:$0xff]  ;;  %v37_v12 = vld [vmem:[#allocation2 + $0x70] sm:$0xff]  ;;  %v36_v27 = vld [vmem:[#allocation2 + $0x68] sm:$0xff]  ;;  %s740_s21 = smov 48   ;;  %vm631_vm1 = vcmask 130048  }
  0x16   :  { %v43_v6 = vunpack.c.0.s8 %v42_v2  ;;  %v75_v7 = vunpack.c.0.s8 %v74_v4  ;;  %v175_v13 = vcombine.low %v31_v9, %v35_v11  ;;  %v176_v14 = vcombine.high %v31_v9, %v35_v11  ;;  %v23_v15 = vld [vmem:[#allocation2] sm:$0xff]  ;;  %v25_v16 = vld [vmem:[#allocation2 + $0x10] sm:$0xff]  ;;  %v34_v60 = vld [vmem:[#allocation2 + $0x58] sm:$0xff]  ;;  %s741_s22 = smov [#allocation5]  }
  0x17   :  { %v191_v18 = vcombine.low %v33_v10, %v37_v12  ;;  %v192_v19 = vcombine.high %v33_v10, %v37_v12  ;;  %v27_v20 = vld [vmem:[#allocation2 + $0x20] sm:$0xff]  ;;  %v29_v21 = vld [vmem:[#allocation2 + $0x30] sm:$0xff]  ;;  %v243_v34 = vcombine.low %v32_v22, %v36_v27  ;;  %v244_v35 = vcombine.high %v32_v22, %v36_v27  ;;  %v38_v61 = vld [vmem:[#allocation2 + $0x78] sm:$0xff]  ;;  %s656_s23 = sshll.u32 %s741_s22, 4  ;;  %s657_s23 = int_to_ptr.vmem [resolvable:$true] %s656_s23 }
  0x18   :  { %v767_v8 = vsub.s32 %v43_v6, %v45_v5  ;;  %v769_v17 = vsub.s32 %v75_v7, %v45_v5  ;;  %v39_v25 = vcombine.low %v23_v15, %v27_v20  ;;  %v40_v26 = vcombine.high %v23_v15, %v27_v20  ;;  %v24_v11 = vld [vmem:[#allocation2 + $0x8] sm:$0xff]  ;;  %s707_s24 = scalar_lea.vmem %s657_s23, 512  ;;  %p712_p9 = scmp.lt.s32.totalorder %s657_s23, %s657_s23 }
  0x19   :  { %v55_v30 = vcombine.low %v25_v16, %v29_v21  ;;  %v56_v31 = vcombine.high %v25_v16, %v29_v21  ;;  %v259_v9 = vcombine.low %v34_v60, %v38_v61  ;;  %v260_v10 = vcombine.high %v34_v60, %v38_v61  ;;  %v28_v12 = vld [vmem:[#allocation2 + $0x28] sm:$0xff]  ;;  %p708_p8 = scmp.ne.s32.totalorder %s657_s23, %s707_s24  ;;  %p713_p10 = scmp.lt.s32.totalorder %s707_s24, %s707_s24 }
  0x1a   :  { %v183_v23 = vrot.slane %v175_v13, %v767_v8  ;;  %v190_v24 = vrot.slane %v176_v14, %v767_v8  ;;  %v199_v28 = vrot.slane %v191_v18, %v767_v8  ;;  %v206_v29 = vrot.slane %v192_v19, %v767_v8 }
  0x1b   :  { %v47_v32 = vrot.slane %v39_v25, %v767_v8  ;;  %v54_v33 = vrot.slane %v40_v26, %v767_v8  ;;  %v63_v40 = vrot.slane %v55_v30, %v767_v8  ;;  %v70_v41 = vrot.slane %v56_v31, %v767_v8  ;;  %p714_p11 = por %p713_p10, %p712_p9 }
  0x1c   :  { %v207_v36 = vcombine.low %v183_v23, %v199_v28  ;;  %v208_v37 = vcombine.high %v183_v23, %v199_v28  ;;  %v223_v38 = vcombine.low %v190_v24, %v206_v29  ;;  %v224_v39 = vcombine.high %v190_v24, %v206_v29 }
  0x1d   :  { %v251_v42 = vrot.slane %v243_v34, %v767_v8  ;;  %v781_v43 = vrot.slane %v244_v35, %v767_v8  ;;  %v71_v48 = vcombine.low %v47_v32, %v63_v40  ;;  %v72_v49 = vcombine.high %v47_v32, %v63_v40  ;;  %v26_v34 = vld [vmem:[#allocation2 + $0x18] sm:$0xff]  ;;  %p715_p12 = pnand %p714_p11, %p708_p8 }
  0x1e   :  { %v215_v44 = vrot.slane %v207_v36, %v769_v17  ;;  %v222_v45 = vrot.slane %v208_v37, %v769_v17  ;;  %v231_v46 = vrot.slane %v223_v38, %v769_v17  ;;  %v238_v47 = vrot.slane %v224_v39, %v769_v17  ;;  %v30_v35 = vld [vmem:[#allocation2 + $0x38] sm:$0xff] }
  0x1f   :  { %v87_v50 = vcombine.low %v54_v33, %v70_v41  ;;  %v88_v51 = vcombine.high %v54_v33, %v70_v41  ;;  %v79_v56 = vrot.slane %v71_v48, %v769_v17  ;;  %v86_v57 = vrot.slane %v72_v49, %v769_v17 }
  0x20   :  { %v447_v52 = vcombine.low %v215_v44, %v222_v45  ;;  %v672_v53 = vcombine.high %v215_v44, %v222_v45  ;;  %v463_v54 = vcombine.low %v231_v46, %v238_v47  ;;  %v673_v55 = vcombine.high %v231_v46, %v238_v47 }
  0x21   :  { %v95_v58 = vrot.slane %v87_v50, %v769_v17  ;;  %v102_v59 = vrot.slane %v88_v51, %v769_v17  ;;  %v311_v2 = vcombine.low %v79_v56, %v86_v57  ;;  %v668_v3 = vcombine.high %v79_v56, %v86_v57 }
  0x22   :  { %v792_v62 = vrot.slane %v447_v52, %v767_v8  ;;  %v795_v63 = vrot.slane %v672_v53, %v767_v8  ;;  %v798_v0 = vrot.slane %v463_v54, %v767_v8  ;;  %v801_v1 = vrot.slane %v673_v55, %v767_v8 }
  0x23   :  { %v327_v4 = vcombine.low %v95_v58, %v102_v59  ;;  %v669_v5 = vcombine.high %v95_v58, %v102_v59  ;;  %v808_v13 = vrot.slane %v311_v2, %v767_v8  ;;  %v811_v14 = vrot.slane %v668_v3, %v767_v8 }
  0x24   :  { %v479_v6 = vcombine.low %v792_v62, %v795_v63  ;;  %v495_v7 = vcombine.low %v798_v0, %v801_v1  ;;  %v267_v20 = vrot.slane %v259_v9, %v767_v8  ;;  %v274_v21 = vrot.slane %v260_v10, %v767_v8 }
  0x25   :  { %v814_v15 = vrot.slane %v327_v4, %v767_v8  ;;  %v817_v16 = vrot.slane %v669_v5, %v767_v8  ;;  %v343_v22 = vcombine.low %v808_v13, %v811_v14  ;;  %v107_v24 = vcombine.low %v24_v11, %v28_v12 }
  0x26   :  { %v820_v18 = vrot.slane %v479_v6, %v769_v17  ;;  %v823_v19 = vrot.slane %v495_v7, %v769_v17  ;;  %v108_v25 = vcombine.high %v24_v11, %v28_v12  ;;  %v275_v28 = vcombine.low %v251_v42, %v267_v20 }
  0x27   :  { %v359_v23 = vcombine.low %v814_v15, %v817_v16  ;;  %v276_v29 = vcombine.high %v251_v42, %v267_v20  ;;  %v836_v30 = vrot.slane %v343_v22, %v769_v17  ;;  %v291_v32 = vcombine.low %v781_v43, %v274_v21 }
  0x28   :  { %v512_v26 = vcombine.high %v820_v18, %v823_v19  ;;  %v511_v27 = vcombine.low %v820_v18, %v823_v19  ;;  %v292_v33 = vcombine.high %v781_v43, %v274_v21  ;;  %v283_v36 = vrot.slane %v275_v28, %v769_v17 }
  0x29   :  { %v839_v31 = vrot.slane %v359_v23, %v769_v17  ;;  %v290_v37 = vrot.slane %v276_v29, %v769_v17  ;;  %v115_v38 = vrot.slane %v107_v24, %v767_v8  ;;  %v122_v39 = vrot.slane %v108_v25, %v767_v8 }
  0x2a   :  { %591 = vrot.lane.b32.xlu1 %v512_v26, %s738_s0  ;;  %v299_v42 = vrot.slane %v291_v32, %v769_v17  ;;  %v306_v43 = vrot.slane %v292_v33, %v769_v17  ;;  %v123_v46 = vcombine.low %v26_v34, %v30_v35  ;;  %v124_v47 = vcombine.high %v26_v34, %v30_v35 }
  0x2b   :  { %v376_v40 = vcombine.high %v836_v30, %v839_v31  ;;  %v375_v41 = vcombine.low %v836_v30, %v839_v31  ;;  %v515_v44 = vcombine.low %v283_v36, %v290_v37  ;;  %v674_v45 = vcombine.high %v283_v36, %v290_v37 }
  0x2c   :  { %v531_v48 = vcombine.low %v299_v42, %v306_v43  ;;  %v675_v49 = vcombine.high %v299_v42, %v306_v43  ;;  %v131_v52 = vrot.slane %v123_v46, %v767_v8  ;;  %v138_v53 = vrot.slane %v124_v47, %v767_v8 }
  0x2d   :  { %587 = vrot.lane.b32.xlu0 %v376_v40, %s738_s0  ;;  %v522_v50 = vrot.slane %v515_v44, %v767_v8  ;;  %v530_v51 = vrot.slane %v674_v45, %v767_v8  ;;  %v344_v11 = vcombine.high %v808_v13, %v811_v14  ;;  %v360_v22 = vcombine.high %v814_v15, %v817_v16 }
  0x2e   :  { %v538_v54 = vrot.slane %v531_v48, %v767_v8  ;;  %v546_v55 = vrot.slane %v675_v49, %v767_v8  ;;  %v139_v57 = vcombine.low %v115_v38, %v131_v52  ;;  %v140_v58 = vcombine.high %v115_v38, %v131_v52 }
  0x2f   :  { %v547_v56 = vcombine.low %v522_v50, %v530_v51  ;;  %v155_v59 = vcombine.low %v122_v39, %v138_v53  ;;  %v156_v61 = vcombine.high %v122_v39, %v138_v53  ;;  %v548_v25 = vcombine.high %v522_v50, %v530_v51 }
  0x30   :  { %v563_v60 = vcombine.low %v538_v54, %v546_v55  ;;  %v147_v3 = vrot.slane %v139_v57, %v769_v17  ;;  %v154_v4 = vrot.slane %v140_v58, %v769_v17  ;;  %v564_v13 = vcombine.high %v538_v54, %v546_v55 }
  0x31   :  { %v862_v2 = vrot.slane %v547_v56, %v769_v17  ;;  %v163_v5 = vrot.slane %v155_v59, %v769_v17  ;;  %v170_v7 = vrot.slane %v156_v61, %v769_v17  ;;  %v358_v32 = vrot.slane %v344_v11, %v769_v17 }
  0x32   :  { %v868_v6 = vrot.slane %v563_v60, %v769_v17  ;;  %v379_v9 = vcombine.low %v147_v3, %v154_v4  ;;  %v670_v10 = vcombine.high %v147_v3, %v154_v4  ;;  %v374_v15 = vrot.slane %v360_v22, %v769_v17 }
  0x33   :  { %v395_v20 = vcombine.low %v163_v5, %v170_v7  ;;  %v671_v21 = vcombine.high %v163_v5, %v170_v7  ;;  %v562_v37 = vrot.slane %v548_v25, %v769_v17  ;;  %v578_v40 = vrot.slane %v564_v13, %v769_v17 }
  0x34   :  { %v580_v12 = vcombine.high %v862_v2, %v868_v6  ;;  %v386_v23 = vrot.slane %v379_v9, %v767_v8  ;;  %v394_v24 = vrot.slane %v670_v10, %v767_v8  ;;  %v579_v16 = vcombine.low %v862_v2, %v868_v6 }
  0x35   :  { %v402_v26 = vrot.slane %v395_v20, %v767_v8  ;;  %v410_v28 = vrot.slane %v671_v21, %v767_v8  ;;  %v480_v8 = vcombine.high %v792_v62, %v795_v63  ;;  %v496_v42 = vcombine.high %v798_v0, %v801_v1 }
  0x36   :  { %593 = vrot.lane.b32.xlu1 %v580_v12, %s738_s0  ;;  %v411_v14 = vcombine.low %v386_v23, %v394_v24  ;;  %v412_v29 = vcombine.high %v386_v23, %v394_v24  ;;  %v377_v46 = vcombine.low %v358_v32, %v374_v15  ;;  %v581_v47 = vcombine.low %v562_v37, %v578_v40 }
  0x37   :  { %v427_v33 = vcombine.low %v402_v26, %v410_v28  ;;  %v428_v34 = vcombine.high %v402_v26, %v410_v28  ;;  %v494_v62 = vrot.slane %v480_v8, %v769_v17  ;;  %v510_v63 = vrot.slane %v496_v42, %v769_v17 }
  0x38   :  { %v419_v35 = vrot.slane %v411_v14, %v769_v17  ;;  %v426_v36 = vrot.slane %v412_v29, %v769_v17  ;;  %v378_v0 = vcombine.high %v358_v32, %v374_v15  ;;  %v582_v1 = vcombine.high %v562_v37, %v578_v40 }
  0x39   :  { %v435_v38 = vrot.slane %v427_v33, %v769_v17  ;;  %v442_v39 = vrot.slane %v428_v34, %v769_v17  ;;  %v513_v48 = vcombine.low %v494_v62, %v510_v63  ;;  %v514_v50 = vcombine.high %v494_v62, %v510_v63 }
  0x3a   :  { %vm641_vm2 = vcmask 392192   ;;  %vm646_vm3 = vcmask 523264  }
  0x3b   :  { %v444_v43 = vcombine.high %v419_v35, %v435_v38  ;;  %v445_v44 = vcombine.low %v426_v36, %v442_v39  ;;  %v443_v45 = vcombine.low %v419_v35, %v435_v38  ;;  %v446_v49 = vcombine.high %v426_v36, %v442_v39 }
  0x3d   :  { %589 = vrot.lane.b32.xlu0 %v444_v43, %s738_s0  ;;  %605 = vrot.lane.b32.xlu1 %v445_v44, %s739_s20 }
  0x41   :  { %603 = vrot.lane.b32.xlu0 %v377_v46, %s739_s20  ;;  %609 = vrot.lane.b32.xlu1 %v581_v47, %s739_s20 }
  0x45   :  { %607 = vrot.lane.b32.xlu0 %v513_v48, %s739_s20  ;;  %621 = vrot.lane.b32.xlu1 %v446_v49, %s740_s21 }
  0x49   :  { %619 = vrot.lane.b32.xlu0 %v378_v0, %s740_s21  ;;  %625 = vrot.lane.b32.xlu1 %v582_v1, %s740_s21 }
  0x4d   :  { %623 = vrot.lane.b32.xlu0 %v514_v50, %s740_s21 }
  0x9c   :  { %v592_v51 = vpop.permute.xlu1 %591 }
  0x9d   :  { %v634_v30 = vsel %vm631_vm1, %v511_v27, %v592_v51 }
  0x9f   :  { %v588_v52 = vpop.permute.xlu0 %587 }
  0xa0   :  { %v632_v2 = vsel %vm631_vm1, %v375_v41, %v588_v52 }
  0xa8   :  { %v594_v53 = vpop.permute.xlu1 %593 }
  0xa9   :  { %v635_v3 = vsel %vm631_vm1, %v579_v16, %v594_v53 }
  0xaf   :  { %v590_v54 = vpop.permute.xlu0 %589  ;;  %v606_v55 = vpop.permute.xlu1 %605 }
  0xb0   :  { %v633_v57 = vsel %vm631_vm1, %v443_v45, %v590_v54 }
  0xb1   :  { %v638_v58 = vsel %vm636_vm0, %v633_v57, %v606_v55 }
  0xb3   :  { %v604_v56 = vpop.permute.xlu0 %603  ;;  %v610_v17 = vpop.permute.xlu1 %609 }
  0xb4   :  { %v637_v4 = vsel %vm636_vm0, %v632_v2, %v604_v56  ;;  %v640_v5 = vsel %vm636_vm0, %v635_v3, %v610_v17 }
  0xb7   :  { %v608_v59 = vpop.permute.xlu0 %607  ;;  %v622_v60 = vpop.permute.xlu1 %621 }
  0xb8   :  { %v643_v61 = vsel %vm641_vm2, %v638_v58, %v622_v60  ;;  %v639_v31 = vsel %vm636_vm0, %v634_v30, %v608_v59 }
  0xb9   :  { %648 = vst.msk [vmem:[#allocation5 + $0x8] sm:$0xff] %vm646_vm3, %v643_v61 }
  0xbb   :  { %v620_v6 = vpop.permute.xlu0 %619  ;;  %v626_v7 = vpop.permute.xlu1 %625 }
  0xbc   :  { %v642_v9 = vsel %vm641_vm2, %v637_v4, %v620_v6  ;;  %v645_v10 = vsel %vm641_vm2, %v640_v5, %v626_v7 }
  0xbd   :  { %647 = vst.msk [vmem:[#allocation5] sm:$0xff] %vm646_vm3, %v642_v9  ;;  %650 = vst.msk [vmem:[#allocation5 + $0x18] sm:$0xff] %vm646_vm3, %v645_v10 }
  0xbf   :  { %v624_v41 = vpop.permute.xlu0 %623 }
  0xc0   :  { %v644_v11 = vsel %vm641_vm2, %v639_v31, %v624_v41 }
  0xc1   :  { %649 = vst.msk [vmem:[#allocation5 + $0x10] sm:$0xff] %vm646_vm3, %v644_v11 }
  0xc2   :  { %718 = shalt.err (!%p715_p12)
}
  0xc3   :  { %s719_s27 = scalar_lea.hbm %s937_s1, 512 }
  0xc4   :  { %p720_p13 = scmp.ne.s32.totalorder %s937_s1, %s719_s27  ;;  %p723_p0 = scmp.lt.u32.totalorder %s719_s27, %s937_s1 }
  0xc6   :  { %p725_p1 = pnand %p723_p0, %p720_p13 }
  0xc8   :  { %728 = shalt.err (!%p725_p1)
}
  0xc9   :  { %662 = dma.vmem_to_hbm [thread:$0]  %s657_s23, 512, %s937_s1, [#allocation4], %s734_s16, %s734_s16, %s735_s17  }
  0xca   :  { %731 = dma.done.wait [#allocation4], 512  }
  0xcb   :  { %732 = vsyncadd [#allocation4], 4294966784 }
  0xcc   :  { %666 = vsyncpa [#allocation3], 1 }
  0xcd   :  { %667 = vsyncpa [#allocation4], 1 }

</bundles_post_ra>
